<compile_context>
chip_gen: v5e
topology: v5e:2x2
jax: 0.10.0
libtpu: 0.0.40
codegen_flags: <defaults>
</compile_context>

<pallas_src>
import math
from functools import partial

import jax
import jax.numpy as jnp
from jax.experimental import pallas as pl
from jax.experimental.pallas import tpu as pltpu


def _round_up(x, m):
    return ((x + m - 1) // m) * m


def _pick_tile(padded_dim, candidates=(512, 256, 128)):
    """Largest 128/256/512-aligned tile that evenly divides the padded dim."""
    for c in candidates:
        if padded_dim % c == 0:
            return c
    return padded_dim  # unreachable when padded_dim is a multiple of 128


def _matmul_kernel(x_ref, w_ref, o_ref, acc_ref):
    # x_ref: (tm, tk) tile of feat, w_ref: (tk, tn) tile of weights.T,
    # o_ref: (tm, tn) output tile, acc_ref: f32 VMEM accumulator.
    k = pl.program_id(2)

    @pl.when(k == 0)
    def _init():
        acc_ref[...] = jnp.zeros_like(acc_ref)

    acc_ref[...] += jnp.dot(
        x_ref[...], w_ref[...], preferred_element_type=jnp.float32
    )

    @pl.when(k == pl.num_programs(2) - 1)
    def _finalize():
        o_ref[...] = acc_ref[...].astype(o_ref.dtype)


def mylinear_forward(feat, weights, label=None, *, compute_dtype=jnp.bfloat16):
    """Pallas implementation of MyLinear.forward.

    feat:    (batch, feature_dim) float32
    weights: (class_num, feature_dim) float32
    label:   unused by the forward math (kept for signature parity)
    returns: (valuation_logits, train_logits, weights)
    """
    del label  # label is not used in the PyTorch forward computation
    batch, feature_dim = feat.shape
    class_num, fd2 = weights.shape
    assert fd2 == feature_dim

    out_dtype = feat.dtype

    # ---- pad to MXU / lane-friendly shapes ---------------------------------
    m_pad = _round_up(batch, 8)
    if m_pad > 256:
        m_pad = _round_up(batch, 256)
    d_pad = _round_up(feature_dim, 128)   # contraction axis
    c_pad = _round_up(class_num, 128)     # output lane axis (lane-dense stores)

    tm = min(m_pad, 256)
    tk = _pick_tile(d_pad)
    tn = _pick_tile(c_pad)

    # One-time transpose of the (static) weights to (D, C): standard NN layout,
    # no per-tile transpose inside the kernel. Zero-padding on D contributes
    # zero to the dot; padded C columns are sliced off afterwards.
    w_t = weights.T.astype(compute_dtype)
    feat_c = feat.astype(compute_dtype)

    feat_p = jnp.pad(feat_c, ((0, m_pad - batch), (0, d_pad - feature_dim)))
    w_p = jnp.pad(w_t, ((0, d_pad - feature_dim), (0, c_pad - class_num)))

    itemsize = jnp.dtype(compute_dtype).itemsize
    cost = pl.CostEstimate(
        flops=2 * m_pad * c_pad * d_pad,
        transcendentals=0,
        bytes_accessed=(
            m_pad * d_pad * itemsize
            + d_pad * c_pad * itemsize
            + m_pad * c_pad * jnp.dtype(out_dtype).itemsize
        ),
    )

    logits_p = pl.pallas_call(
        _matmul_kernel,
        out_shape=jax.ShapeDtypeStruct((m_pad, c_pad), out_dtype),
        grid=(m_pad // tm, c_pad // tn, d_pad // tk),
        in_specs=[
            pl.BlockSpec((tm, tk), lambda i, j, k: (i, k)),
            pl.BlockSpec((tk, tn), lambda i, j, k: (k, j)),
        ],
        out_specs=pl.BlockSpec((tm, tn), lambda i, j, k: (i, j)),
        scratch_shapes=[pltpu.VMEM((tm, tn), jnp.float32)],
        compiler_params=pltpu.CompilerParams(
            dimension_semantics=("parallel", "parallel", "arbitrary"),
        ),
        cost_estimate=cost,
    )(feat_p, w_p)

    logits = logits_p[:batch, :class_num]
    valuation_logits = logits
    train_logits = valuation_logits  # same tensor, as in the PyTorch module
    return valuation_logits, train_logits, weights


def xavier_uniform(key, class_num, feature_dim, dtype=jnp.float32):
    # PyTorch nn.init.xavier_uniform_ on a (class_num, feature_dim) tensor:
    # fan_in = feature_dim, fan_out = class_num, bound = sqrt(6/(fan_in+fan_out))
    bound = math.sqrt(6.0 / (feature_dim + class_num))
    return jax.random.uniform(
        key, (class_num, feature_dim), dtype=dtype, minval=-bound, maxval=bound
    )


if __name__ == "__main__":
    feature_dim = 32
    class_num = 16
    batch = 8

    key = jax.random.PRNGKey(0)
    k_w, k_x, k_l = jax.random.split(key, 3)

    weights = xavier_uniform(k_w, class_num, feature_dim)
    feat = jax.random.normal(k_x, (batch, feature_dim), dtype=jnp.float32)
    label = jax.random.randint(k_l, (batch,), 0, class_num)

    fwd = jax.jit(partial(mylinear_forward, compute_dtype=jnp.bfloat16))
    valuation_logits, train_logits, w_out = fwd(feat, weights, label)
    jax.block_until_ready(valuation_logits)
    jax.block_until_ready(train_logits)
    jax.block_until_ready(w_out)

    # Correctness: compare against a bf16-input / f32-accumulate JAX reference
    # (matches the kernel's compute dtype), plus a loose f32 sanity check.
    ref_bf16 = jnp.dot(
        feat.astype(jnp.bfloat16),
        weights.T.astype(jnp.bfloat16),
        preferred_element_type=jnp.float32,
    )
    ref_f32 = feat @ weights.T

    assert valuation_logits.shape == (batch, class_num)
    assert train_logits.shape == (batch, class_num)
    assert w_out.shape == (class_num, feature_dim)
    assert valuation_logits.dtype == jnp.float32
    assert jnp.allclose(valuation_logits, ref_bf16, atol=1e-2, rtol=1e-2)
    assert jnp.allclose(train_logits, ref_bf16, atol=1e-2, rtol=1e-2)
    assert jnp.allclose(valuation_logits, ref_f32, atol=1e-1, rtol=1e-1)
    assert jnp.allclose(w_out, weights)

    print("KERNEL_OK")
</pallas_src>

<mosaic_0001>
module attributes {stable_mosaic.version = 11 : i64} {
  func.func @_matmul_kernel(%arg0: i32, %arg1: i32, %arg2: i32, %arg3: memref<8x128xbf16, #tpu.memory_space<vmem>>, %arg4: memref<128x128xbf16, #tpu.memory_space<vmem>>, %arg5: memref<8x128xf32, #tpu.memory_space<vmem>>, %arg6: memref<8x128xf32, #tpu.memory_space<vmem>>) attributes {dimension_semantics = [#tpu.dimension_semantics<parallel>, #tpu.dimension_semantics<parallel>, #tpu.dimension_semantics<arbitrary>], iteration_bounds = array<i64: 1, 1, 1>, scalar_prefetch = 0 : i64, scratch_operands = 1 : i64, tpu.core_type = #tpu.core_type<tc>, window_params = [{transform_indices = @transform_0, window_bounds = array<i64: 8, 128>}, {transform_indices = @transform_1, window_bounds = array<i64: 128, 128>}, {transform_indices = @transform_2, window_bounds = array<i64: 8, 128>}]} {
    %c0_i32 = arith.constant 0 : i32
    %0 = arith.cmpi eq, %arg2, %c0_i32 : i32
    %1 = arith.extui %0 : i1 to i32
    %c0_i32_0 = arith.constant 0 : i32
    %2 = arith.cmpi ne, %1, %c0_i32_0 : i32
    scf.if %2 {
      %cst_10 = arith.constant 0.000000e+00 : f32
      %12 = vector.broadcast %cst_10 : f32 to vector<8x128xf32>
      %c0_11 = arith.constant 0 : index
      %c0_12 = arith.constant 0 : index
      %13 = vector.load %arg6[%c0_11, %c0_12] : memref<8x128xf32, #tpu.memory_space<vmem>>, vector<8x128xf32>
      tpu.vector_store %arg6[%c0_11, %c0_12], %12 {strides = array<i32>} : memref<8x128xf32, #tpu.memory_space<vmem>>, vector<8x128xf32>,
    } else {
    }
    %c0 = arith.constant 0 : index
    %c0_1 = arith.constant 0 : index
    %3 = vector.load %arg6[%c0, %c0_1] : memref<8x128xf32, #tpu.memory_space<vmem>>, vector<8x128xf32>
    %c0_2 = arith.constant 0 : index
    %c0_3 = arith.constant 0 : index
    %4 = vector.load %arg3[%c0_2, %c0_3] : memref<8x128xbf16, #tpu.memory_space<vmem>>, vector<8x128xbf16>
    %c0_4 = arith.constant 0 : index
    %c0_5 = arith.constant 0 : index
    %5 = vector.load %arg4[%c0_4, %c0_5] : memref<128x128xbf16, #tpu.memory_space<vmem>>, vector<128x128xbf16>
    %cst = arith.constant dense<0.000000e+00> : vector<8x128xf32>
    %6 = tpu.matmul %4, %5, %cst {dimension_numbers = #tpu.dot_dimension_numbers<[1], [0], [0], [1], [0, 0, 1, 1], [], []>} : vector<8x128xbf16>, vector<128x128xbf16>, vector<8x128xf32> -> vector<8x128xf32>
    %7 = arith.addf %3, %6 : vector<8x128xf32>
    %c0_6 = arith.constant 0 : index
    %c0_7 = arith.constant 0 : index
    %8 = vector.load %arg6[%c0_6, %c0_7] : memref<8x128xf32, #tpu.memory_space<vmem>>, vector<8x128xf32>
    tpu.vector_store %arg6[%c0_6, %c0_7], %7 {strides = array<i32>} : memref<8x128xf32, #tpu.memory_space<vmem>>, vector<8x128xf32>,
    %c0_i32_8 = arith.constant 0 : i32
    %9 = arith.cmpi eq, %arg2, %c0_i32_8 : i32
    %10 = arith.extui %9 : i1 to i32
    %c0_i32_9 = arith.constant 0 : i32
    %11 = arith.cmpi ne, %10, %c0_i32_9 : i32
    scf.if %11 {
      %c0_10 = arith.constant 0 : index
      %c0_11 = arith.constant 0 : index
      %12 = vector.load %arg6[%c0_10, %c0_11] : memref<8x128xf32, #tpu.memory_space<vmem>>, vector<8x128xf32>
      %c0_12 = arith.constant 0 : index
      %c0_13 = arith.constant 0 : index
      %13 = vector.load %arg5[%c0_12, %c0_13] : memref<8x128xf32, #tpu.memory_space<vmem>>, vector<8x128xf32>
      tpu.vector_store %arg5[%c0_12, %c0_13], %12 {strides = array<i32>} : memref<8x128xf32, #tpu.memory_space<vmem>>, vector<8x128xf32>,
    } else {
    }
    return
  }
  func.func @transform_0(%arg0: i32, %arg1: i32, %arg2: i32) -> (i32, i32) {
    %c0_i32 = arith.constant 0 : i32
    return %arg0, %arg2 : i32, i32
  }
  func.func @transform_1(%arg0: i32, %arg1: i32, %arg2: i32) -> (i32, i32) {
    %c0_i32 = arith.constant 0 : i32
    return %arg2, %arg1 : i32, i32
  }
  func.func @transform_2(%arg0: i32, %arg1: i32, %arg2: i32) -> (i32, i32) {
    %c0_i32 = arith.constant 0 : i32
    return %arg0, %arg1 : i32, i32
  }
}

</mosaic_0001>

<bundles_post_ra>
// kernel: mylinear_forward.1
= control target key start
LH: loop header
LB: loop body
LE: loop exit
PB: predicated region body
PF: predicated region fallthrough
CT: control target
= control target key end

     0   :  { %s191_s1 = inlined_call_operand.vmem [shape: bf16[128,128], index: 1, kind: input, shape index: {}]   ;;  %s192_s0 = inlined_call_operand.vmem [shape: bf16[8,128], index: 0, kind: input, shape index: {}]   ;;  %s193_s2 = inlined_call_operand.vmem [shape: f32[8,128], index: 2, kind: output, shape index: {}]  }
   0x1   :  { %v145_v0 = vld [vmem:[%s191_s1 + $0x38] sm:$0xff]  ;;  %v144_v1 = vld [vmem:[%s191_s1 + $0x30] sm:$0xff]  ;;  %v143_v2 = vld [vmem:[%s191_s1 + $0x28] sm:$0xff] }
   0x2   :  { %82 = vmatpush.bf16.msra.mxu0 %v145_v0  ;;  %v142_v3 = vld [vmem:[%s191_s1 + $0x20] sm:$0xff]  ;;  %v141_v4 = vld [vmem:[%s191_s1 + $0x18] sm:$0xff]  ;;  %v140_v5 = vld [vmem:[%s191_s1 + $0x10] sm:$0xff] }
   0x3   :  { %v139_v6 = vld [vmem:[%s191_s1 + $0x8] sm:$0xff]  ;;  %v138_v7 = vld [vmem:[%s191_s1] sm:$0xff] }
   0x4   :  { %v17_v8 = vld [vmem:[%s192_s0] sm:$0xf] }
   0x6   :  { %83 = vmatpush.bf16.msra.mxu0 %v144_v1 }
   0xa   :  { %84 = vmatpush.bf16.msra.mxu0 %v143_v2 }
   0xe   :  { %85 = vmatpush.bf16.msra.mxu0 %v142_v3 }
  0x12   :  { %86 = vmatpush.bf16.msra.mxu0 %v141_v4 }
  0x16   :  { %87 = vmatpush.bf16.msra.mxu0 %v140_v5 }
  0x1a   :  { %88 = vmatpush.bf16.msra.mxu0 %v139_v6 }
  0x1e   :  { %89 = vmatpush.bf16.msra.mxu0 %v138_v7 }
  0x21   :  { %90 = vmatmul.bf16.vlgmr.msra.gmra.mxu0 %v17_v8 }
  0x9e   :  { %v91_v9 = vpop.f32.mrf.mxu0 }
  0x9f   :  { %101 = vst [vmem:[%s193_s2] sm:$0xff] %v91_v9 }
  0xa6   :  { %v93_v10 = vpop.f32.mrf.mxu0 }

</bundles_post_ra>
